<compile_context>
chip_gen: v7x
topology: tpu7x:2x2x1
jax: 0.10.0
libtpu: 0.0.40
codegen_flags: <defaults>
</compile_context>

<pallas_src>
import functools
import math

import jax
import jax.numpy as jnp
from jax import lax
from jax.experimental import pallas as pl
from jax.experimental.pallas import tpu as pltpu


# ------------------------------ VMEM helpers --------------------------------

def _vmem_limit_bytes():
    """Generation-aware scoped-VMEM limit (75% of physical, capped at 100 MiB)."""
    cap = 64 * 1024 * 1024            # conservative floor (v7x per-core VMEM)
    try:
        cap = int(getattr(pltpu.get_tpu_info(), "vmem_capacity_bytes", cap)) or cap
    except Exception:
        pass
    return min(int(cap * 3 // 4), 100 * 1024 * 1024)


def _pick_row_tile(m, bytes_per_row, budget_bytes):
    """Largest power-of-two row tile in [8, 512] that fits the activation budget
    (never wider than the row-padded problem size)."""
    m8 = max(8, ((m + 7) // 8) * 8)
    tile = 8
    t = 16
    while t <= 512 and t <= m8 and t * bytes_per_row <= budget_bytes:
        tile = t
        t *= 2
    return tile


# ------------------------- fused MHA + add&norm kernel -----------------------

def _mha_addnorm_kernel(q_ref, k_ref, v_ref, mask_ref, wqkv_ref, bqkv_ref,
                        wo_ref, bo_ref, ga_ref, gb_ref, o_ref, *, num_heads, eps):
    tq = q_ref.shape[1]
    S = k_ref.shape[1]
    D = q_ref.shape[2]
    dk = D // num_heads

    q = q_ref[0]                                   # (tq, D)
    k = k_ref[0]                                   # (S, D)
    v = v_ref[0]                                   # (S, D)

    # Q/K/V projections against the fused (D, 3D) weight (1/sqrt(dk) is pre-folded
    # into the Q slice at parameter-prep time).
    # TODO(synk): when q is k is v (plain self-attention) DMA the input once and emit a
    #             single (S, D) x (D, 3D) projection instead of three N=D matmuls.
    qp = jnp.dot(q, wqkv_ref[:, 0 * D:1 * D], preferred_element_type=jnp.float32) + bqkv_ref[:, 0 * D:1 * D]
    kp = jnp.dot(k, wqkv_ref[:, 1 * D:2 * D], preferred_element_type=jnp.float32) + bqkv_ref[:, 1 * D:2 * D]
    vp = jnp.dot(v, wqkv_ref[:, 2 * D:3 * D], preferred_element_type=jnp.float32) + bqkv_ref[:, 2 * D:3 * D]

    # Additive mask row, computed once (masked_fill(mask == 0, -1e9)); broadcasts over
    # query rows and heads.
    neg_add = jnp.where(mask_ref[0] == 0, -1e9, 0.0)            # (1, S) f32

    # Per-head attention.  Each head's context is folded straight into the output
    # projection (ctx @ Wo == sum_h ctx_h @ Wo[h*dk:(h+1)*dk, :]) -- no lane concat,
    # no scratch relayout, and the projection matmuls keep N=D.
    # TODO(synk): for S >~ 1-2K switch to a flash-style online softmax over KV tiles.
    y = jnp.zeros((tq, D), jnp.float32)
    for h in range(num_heads):                      # static unroll, heads independent
        sl = slice(h * dk, (h + 1) * dk)
        s = lax.dot_general(qp[:, sl], kp[:, sl], (((1,), (1,)), ((), ())),
                            preferred_element_type=jnp.float32)            # (tq, S)
        s = s + neg_add
        s = s - jnp.max(s, axis=-1, keepdims=True)
        p = jnp.exp(s)
        p = p * pl.reciprocal(jnp.sum(p, axis=-1, keepdims=True), approx=True)
        ctx_h = jnp.dot(p, vp[:, sl], preferred_element_type=jnp.float32)   # (tq, dk)
        y = y + jnp.dot(ctx_h, wo_ref[sl, :], preferred_element_type=jnp.float32)
    y = y + bo_ref[...]

    # Residual rows of v matching this query tile.
    row0 = pl.multiple_of(pl.program_id(1) * tq, tq)
    v_res = v_ref[0, pl.ds(row0, tq), :]            # (tq, D)

    # Residual + torch LayerNorm (unbiased std, eps added to std); (rows,1) reciprocal
    # instead of a full (rows, D) divide.
    z = v_res + y
    mean = jnp.mean(z, axis=-1, keepdims=True)
    diff = z - mean
    std = jnp.sqrt(jnp.sum(diff * diff, axis=-1, keepdims=True) * (1.0 / (D - 1)))
    inv = pl.reciprocal(std + eps, approx=False)
    o_ref[0] = (diff * (ga_ref[...] * inv) + gb_ref[...]).astype(o_ref.dtype)


def mha_addnorm(q, k, v, mask, pp, eps=1e-6):
    """LayerNorm(v + MultiHeadAttention(q, k, v, mask)) as one Pallas call."""
    B, S, D = q.shape
    num_heads = pp["num_heads"]

    # Query-row tiling: keeps per-step VMEM bounded and gives enough grid steps to shard
    # across v7x's two TensorCores even at small B.
    tq = S
    for cand in (256, 128):
        if S % cand == 0:
            tq = cand
            break
    nq = S // tq

    kernel = functools.partial(_mha_addnorm_kernel, num_heads=num_heads, eps=eps)
    # TODO(synk): single-buffer the grid-invariant weight blocks (pipeline_mode=pl.Buffered(1))
    #             once that path is reliable on the top-level pallas_call pipeline.
    return pl.pallas_call(
        kernel,
        grid=(B, nq),
        out_shape=jax.ShapeDtypeStruct((B, S, D), q.dtype),
        in_specs=[
            pl.BlockSpec((1, tq, D), lambda b, i: (b, i, 0)),      # q rows (tiled)
            pl.BlockSpec((1, S, D), lambda b, i: (b, 0, 0)),       # k (full, per batch)
            pl.BlockSpec((1, S, D), lambda b, i: (b, 0, 0)),       # v (values + residual)
            pl.BlockSpec((1, 1, S), lambda b, i: (b, 0, 0)),       # mask (key-broadcast)
            pl.BlockSpec((D, 3 * D), lambda b, i: (0, 0)),         # wqkv (resident)
            pl.BlockSpec((1, 3 * D), lambda b, i: (0, 0)),         # bqkv
            pl.BlockSpec((D, D), lambda b, i: (0, 0)),             # wo
            pl.BlockSpec((1, D), lambda b, i: (0, 0)),             # bo
            pl.BlockSpec((1, D), lambda b, i: (0, 0)),             # ln1 gamma
            pl.BlockSpec((1, D), lambda b, i: (0, 0)),             # ln1 beta
        ],
        out_specs=pl.BlockSpec((1, tq, D), lambda b, i: (b, i, 0)),
        compiler_params=pltpu.CompilerParams(
            dimension_semantics=("parallel", "parallel"),
            vmem_limit_bytes=_vmem_limit_bytes()),
    )(q, k, v, mask, pp["wqkv"], pp["bqkv"], pp["wo"], pp["bo"],
      pp["ln1_a"], pp["ln1_b"])


# ------------------------- fused FFN + add&norm kernel -----------------------

def _ffn_addnorm_kernel(x_ref, w1_ref, b1_ref, w2_ref, b2_ref, ga_ref, gb_ref,
                        o_ref, *, eps):
    D = x_ref.shape[-1]
    x = x_ref[...]                                                        # (tm, D)
    h = jnp.dot(x, w1_ref[...], preferred_element_type=jnp.float32) + b1_ref[...]
    h = jnp.maximum(h, 0.0)
    y = jnp.dot(h, w2_ref[...], preferred_element_type=jnp.float32) + b2_ref[...]

    # Residual + torch LayerNorm epilogue (unbiased std, eps added to std).
    z = x + y
    mean = jnp.mean(z, axis=-1, keepdims=True)
    diff = z - mean
    std = jnp.sqrt(jnp.sum(diff * diff, axis=-1, keepdims=True) * (1.0 / (D - 1)))
    inv = pl.reciprocal(std + eps, approx=False)
    o_ref[...] = (diff * (ga_ref[...] * inv) + gb_ref[...]).astype(o_ref.dtype)


def ffn_addnorm(x, pp, eps=1e-6):
    """LayerNorm(x + FeedForward(x)) as one row-tiled Pallas call."""
    B, S, D = x.shape
    M = B * S
    dff = pp["w1"].shape[1]

    vmem_limit = _vmem_limit_bytes()
    w_item = jnp.dtype(pp["w1"].dtype).itemsize
    # Resident weight/bias bytes (conservatively assume double buffering).
    weight_bytes = 2 * w_item * (2 * D * dff + dff + 5 * D)
    budget = max(vmem_limit - weight_bytes, 2 * 1024 * 1024)
    # Live f32 activation bytes per row (double-buffered in/out tiles + hidden + LN temps).
    per_row = 4 * (2 * 2 * D + dff + 2 * D)
    tm = _pick_row_tile(M, per_row, budget)

    # Pad the flattened rows up to the tile instead of degenerating to one giant block.
    Mp = ((M + tm - 1) // tm) * tm
    x2 = x.reshape(M, D)
    if Mp != M:
        x2 = jnp.pad(x2, ((0, Mp - M), (0, 0)))    # tail rows sliced off below

    kernel = functools.partial(_ffn_addnorm_kernel, eps=eps)
    y = pl.pallas_call(
        kernel,
        grid=(Mp // tm,),
        out_shape=jax.ShapeDtypeStruct((Mp, D), x.dtype),
        in_specs=[
            pl.BlockSpec((tm, D), lambda i: (i, 0)),           # x rows (tiled)
            pl.BlockSpec((D, dff), lambda i: (0, 0)),          # w1 (resident)
            pl.BlockSpec((1, dff), lambda i: (0, 0)),          # b1
            pl.BlockSpec((dff, D), lambda i: (0, 0)),          # w2
            pl.BlockSpec((1, D), lambda i: (0, 0)),            # b2
            pl.BlockSpec((1, D), lambda i: (0, 0)),            # ln2 gamma
            pl.BlockSpec((1, D), lambda i: (0, 0)),            # ln2 beta
        ],
        out_specs=pl.BlockSpec((tm, D), lambda i: (i, 0)),
        compiler_params=pltpu.CompilerParams(
            dimension_semantics=("parallel",),
            vmem_limit_bytes=vmem_limit),
    )(x2, pp["w1"], pp["b1"], pp["w2"], pp["b2"], pp["ln2_a"], pp["ln2_b"])
    if Mp != M:
        y = y[:M]
    return y.reshape(B, S, D)


# ------------------------------ EncoderLayer ---------------------------------

def encoder_layer(q, k, v, mask, prepared_params):
    """EncoderLayer.forward(q, k, v, mask). Dropout is identity (eval mode)."""
    x = mha_addnorm(q, k, v, mask, prepared_params)   # LayerNorm(v + attn(q,k,v,mask))
    x = ffn_addnorm(x, prepared_params)               # LayerNorm(x + ffn(x))
    return x


# ------------------------------ Parameters -----------------------------------

def init_params(key, d_model, d_ff):
    keys = jax.random.split(key, 12)
    n = lambda k, shape: (jax.random.normal(k, shape, jnp.float32) * 0.1)
    attn = dict(
        wq=n(keys[0], (d_model, d_model)), bq=jnp.zeros((d_model,), jnp.float32),
        wk=n(keys[1], (d_model, d_model)), bk=jnp.zeros((d_model,), jnp.float32),
        wv=n(keys[2], (d_model, d_model)), bv=jnp.zeros((d_model,), jnp.float32),
        wo=n(keys[3], (d_model, d_model)), bo=jnp.zeros((d_model,), jnp.float32),
    )
    ff = dict(
        w1=n(keys[4], (d_model, d_ff)), b1=jnp.zeros((d_ff,), jnp.float32),
        w2=n(keys[5], (d_ff, d_model)), b2=jnp.zeros((d_model,), jnp.float32),
    )
    return dict(
        attn=attn, ff=ff,
        ln1_a=jnp.ones((d_model,), jnp.float32), ln1_b=jnp.zeros((d_model,), jnp.float32),
        ln2_a=jnp.ones((d_model,), jnp.float32), ln2_b=jnp.zeros((d_model,), jnp.float32),
    )


def prepare_params(raw, num_heads, dtype=None):
    """One-time parameter prep (hoisted out of the forward path): fuse the QKV weights,
    fold the 1/sqrt(dk) attention scale into the Q projection, reshape biases / LN params
    to lane-dense (1, D) rows, and optionally cast weights to `dtype` (e.g. bf16)."""
    a, f = raw["attn"], raw["ff"]
    D = a["wq"].shape[0]
    scale = 1.0 / math.sqrt(D // num_heads)
    cast = (lambda t: t.astype(dtype)) if dtype is not None else (lambda t: t)
    wqkv = jnp.concatenate([a["wq"] * scale, a["wk"], a["wv"]], axis=1)        # (D, 3D)
    bqkv = jnp.concatenate([a["bq"] * scale, a["bk"], a["bv"]]).reshape(1, 3 * D)
    dff = f["w1"].shape[1]
    return dict(
        num_heads=num_heads,
        wqkv=cast(wqkv), bqkv=cast(bqkv),
        wo=cast(a["wo"]), bo=cast(a["bo"].reshape(1, D)),
        ln1_a=cast(raw["ln1_a"].reshape(1, D)), ln1_b=cast(raw["ln1_b"].reshape(1, D)),
        w1=cast(f["w1"]), b1=cast(f["b1"].reshape(1, dff)),
        w2=cast(f["w2"]), b2=cast(f["b2"].reshape(1, D)),
        ln2_a=cast(raw["ln2_a"].reshape(1, D)), ln2_b=cast(raw["ln2_b"].reshape(1, D)),
    )


# ----------------------------------- Main ------------------------------------

if __name__ == "__main__":
    B, S, D, H, DFF = 2, 8, 32, 4, 64

    key = jax.random.PRNGKey(0)
    kq, kk, kv, kp = jax.random.split(key, 4)
    q = jax.random.normal(kq, (B, S, D), jnp.float32)
    k = jax.random.normal(kk, (B, S, D), jnp.float32)
    v = jax.random.normal(kv, (B, S, D), jnp.float32)
    mask = jnp.ones((B, 1, S), jnp.float32)   # src mask, broadcast over heads/queries

    raw = init_params(kp, D, DFF)
    pp = prepare_params(raw, num_heads=H)     # one-time: QKV fuse, scale fold, reshapes

    out = encoder_layer(q, k, v, mask, pp)
    jax.block_until_ready(out)
    assert out.shape == (B, S, D)
    assert bool(jnp.isfinite(out).all())
    print("KERNEL_OK")
</pallas_src>

<mosaic_0001>
module attributes {stable_mosaic.version = 11 : i64} {
  func.func @_mha_addnorm_kernel(%arg0: i32, %arg1: i32, %arg2: memref<1x8x32xf32, #tpu.memory_space<vmem>>, %arg3: memref<1x8x32xf32, #tpu.memory_space<vmem>>, %arg4: memref<1x8x32xf32, #tpu.memory_space<vmem>>, %arg5: memref<1x1x8xf32, #tpu.memory_space<vmem>>, %arg6: memref<32x96xf32, #tpu.memory_space<vmem>>, %arg7: memref<1x96xf32, #tpu.memory_space<vmem>>, %arg8: memref<32x32xf32, #tpu.memory_space<vmem>>, %arg9: memref<1x32xf32, #tpu.memory_space<vmem>>, %arg10: memref<1x32xf32, #tpu.memory_space<vmem>>, %arg11: memref<1x32xf32, #tpu.memory_space<vmem>>, %arg12: memref<1x8x32xf32, #tpu.memory_space<vmem>>) attributes {dimension_semantics = [#tpu.dimension_semantics<parallel>, #tpu.dimension_semantics<parallel>], iteration_bounds = array<i64: 2, 1>, scalar_prefetch = 0 : i64, scratch_operands = 0 : i64, tpu.core_type = #tpu.core_type<tc>, window_params = [{transform_indices = @transform_0, window_bounds = array<i64: 1, 8, 32>}, {transform_indices = @transform_1, window_bounds = array<i64: 1, 8, 32>}, {transform_indices = @transform_2, window_bounds = array<i64: 1, 8, 32>}, {transform_indices = @transform_3, window_bounds = array<i64: 1, 1, 8>}, {pipeline_mode = #tpu.pipeline_mode<synchronous>, transform_indices = @transform_4, window_bounds = array<i64: 32, 96>}, {pipeline_mode = #tpu.pipeline_mode<synchronous>, transform_indices = @transform_5, window_bounds = array<i64: 1, 96>}, {pipeline_mode = #tpu.pipeline_mode<synchronous>, transform_indices = @transform_6, window_bounds = array<i64: 32, 32>}, {pipeline_mode = #tpu.pipeline_mode<synchronous>, transform_indices = @transform_7, window_bounds = array<i64: 1, 32>}, {pipeline_mode = #tpu.pipeline_mode<synchronous>, transform_indices = @transform_8, window_bounds = array<i64: 1, 32>}, {pipeline_mode = #tpu.pipeline_mode<synchronous>, transform_indices = @transform_9, window_bounds = array<i64: 1, 32>}, {transform_indices = @transform_10, window_bounds = array<i64: 1, 8, 32>}]} {
    %c0 = arith.constant 0 : index
    %c0_0 = arith.constant 0 : index
    %c0_1 = arith.constant 0 : index
    %0 = vector.load %arg2[%c0, %c0_0, %c0_1] : memref<1x8x32xf32, #tpu.memory_space<vmem>>, vector<1x8x32xf32>
    %1 = vector.shape_cast %0 : vector<1x8x32xf32> to vector<8x32xf32>
    %c0_2 = arith.constant 0 : index
    %c0_3 = arith.constant 0 : index
    %c0_4 = arith.constant 0 : index
    %2 = vector.load %arg3[%c0_2, %c0_3, %c0_4] : memref<1x8x32xf32, #tpu.memory_space<vmem>>, vector<1x8x32xf32>
    %3 = vector.shape_cast %2 : vector<1x8x32xf32> to vector<8x32xf32>
    %c0_5 = arith.constant 0 : index
    %c0_6 = arith.constant 0 : index
    %c0_7 = arith.constant 0 : index
    %4 = vector.load %arg4[%c0_5, %c0_6, %c0_7] : memref<1x8x32xf32, #tpu.memory_space<vmem>>, vector<1x8x32xf32>
    %5 = vector.shape_cast %4 : vector<1x8x32xf32> to vector<8x32xf32>
    %c0_8 = arith.constant 0 : index
    %c0_9 = arith.constant 0 : index
    %6 = vector.load %arg6[%c0_8, %c0_9] : memref<32x96xf32, #tpu.memory_space<vmem>>, vector<32x32xf32>
    %cst = arith.constant dense<0.000000e+00> : vector<8x32xf32>
    %7 = tpu.matmul %1, %6, %cst {dimension_numbers = #tpu.dot_dimension_numbers<[1], [0], [0], [1], [0, 0, 1, 1], [], []>} : vector<8x32xf32>, vector<32x32xf32>, vector<8x32xf32> -> vector<8x32xf32>
    %c0_10 = arith.constant 0 : index
    %c0_11 = arith.constant 0 : index
    %8 = vector.load %arg7[%c0_10, %c0_11] : memref<1x96xf32, #tpu.memory_space<vmem>>, vector<1x32xf32>
    %9 = vector.broadcast %8 : vector<1x32xf32> to vector<8x32xf32>
    %10 = arith.addf %7, %9 : vector<8x32xf32>
    %c0_12 = arith.constant 0 : index
    %c32 = arith.constant 32 : index
    %11 = vector.load %arg6[%c0_12, %c32] : memref<32x96xf32, #tpu.memory_space<vmem>>, vector<32x32xf32>
    %cst_13 = arith.constant dense<0.000000e+00> : vector<8x32xf32>
    %12 = tpu.matmul %3, %11, %cst_13 {dimension_numbers = #tpu.dot_dimension_numbers<[1], [0], [0], [1], [0, 0, 1, 1], [], []>} : vector<8x32xf32>, vector<32x32xf32>, vector<8x32xf32> -> vector<8x32xf32>
    %c0_14 = arith.constant 0 : index
    %c32_15 = arith.constant 32 : index
    %13 = vector.load %arg7[%c0_14, %c32_15] : memref<1x96xf32, #tpu.memory_space<vmem>>, vector<1x32xf32>
    %14 = vector.broadcast %13 : vector<1x32xf32> to vector<8x32xf32>
    %15 = arith.addf %12, %14 : vector<8x32xf32>
    %c0_16 = arith.constant 0 : index
    %c64 = arith.constant 64 : index
    %16 = vector.load %arg6[%c0_16, %c64] : memref<32x96xf32, #tpu.memory_space<vmem>>, vector<32x32xf32>
    %cst_17 = arith.constant dense<0.000000e+00> : vector<8x32xf32>
    %17 = tpu.matmul %5, %16, %cst_17 {dimension_numbers = #tpu.dot_dimension_numbers<[1], [0], [0], [1], [0, 0, 1, 1], [], []>} : vector<8x32xf32>, vector<32x32xf32>, vector<8x32xf32> -> vector<8x32xf32>
    %c0_18 = arith.constant 0 : index
    %c64_19 = arith.constant 64 : index
    %18 = vector.load %arg7[%c0_18, %c64_19] : memref<1x96xf32, #tpu.memory_space<vmem>>, vector<1x32xf32>
    %19 = vector.broadcast %18 : vector<1x32xf32> to vector<8x32xf32>
    %20 = arith.addf %17, %19 : vector<8x32xf32>
    %c0_20 = arith.constant 0 : index
    %c0_21 = arith.constant 0 : index
    %c0_22 = arith.constant 0 : index
    %21 = vector.load %arg5[%c0_20, %c0_21, %c0_22] : memref<1x1x8xf32, #tpu.memory_space<vmem>>, vector<1x1x8xf32>
    %22 = vector.shape_cast %21 : vector<1x1x8xf32> to vector<1x8xf32>
    %cst_23 = arith.constant 0.000000e+00 : f32
    %23 = vector.broadcast %cst_23 : f32 to vector<1x8xf32>
    %24 = arith.cmpf oeq, %22, %23 : vector<1x8xf32>
    %cst_24 = arith.constant -1.000000e+09 : f32
    %cst_25 = arith.constant 0.000000e+00 : f32
    %25 = vector.broadcast %cst_24 : f32 to vector<1x8xf32>
    %26 = vector.broadcast %cst_25 : f32 to vector<1x8xf32>
    %27 = arith.select %24, %25, %26 : vector<1x8xi1>, vector<1x8xf32>
    %cst_26 = arith.constant 0.000000e+00 : f32
    %28 = vector.broadcast %cst_26 : f32 to vector<8x32xf32>
    %29 = vector.extract_strided_slice %10 {offsets = [0, 0], sizes = [8, 8], strides = [1, 1]} : vector<8x32xf32> to vector<8x8xf32>
    %30 = vector.extract_strided_slice %15 {offsets = [0, 0], sizes = [8, 8], strides = [1, 1]} : vector<8x32xf32> to vector<8x8xf32>
    %cst_27 = arith.constant dense<0.000000e+00> : vector<8x8xf32>
    %31 = tpu.matmul %29, %30, %cst_27 {dimension_numbers = #tpu.dot_dimension_numbers<[1], [1], [0], [0], [0, 0, 1, 0], [], []>} : vector<8x8xf32>, vector<8x8xf32>, vector<8x8xf32> -> vector<8x8xf32>
    %32 = vector.broadcast %27 : vector<1x8xf32> to vector<8x8xf32>
    %33 = arith.addf %31, %32 : vector<8x8xf32>
    %cst_28 = arith.constant dense<0xFF800000> : vector<8xf32>
    %34 = vector.multi_reduction <maximumf>, %33, %cst_28 [1] : vector<8x8xf32> to vector<8xf32>
    %35 = vector.shape_cast %34 : vector<8xf32> to vector<8x1xf32>
    %36 = vector.broadcast %35 : vector<8x1xf32> to vector<8x8xf32>
    %37 = arith.subf %33, %36 : vector<8x8xf32>
    %38 = math.exp %37 : vector<8x8xf32>
    %cst_29 = arith.constant dense<0.000000e+00> : vector<8xf32>
    %39 = vector.multi_reduction <add>, %38, %cst_29 [1] : vector<8x8xf32> to vector<8xf32>
    %40 = vector.shape_cast %39 : vector<8xf32> to vector<8x1xf32>
    %41 = tpu.reciprocal %40 {approx = true} : vector<8x1xf32> -> vector<8x1xf32>
    %42 = vector.broadcast %41 : vector<8x1xf32> to vector<8x8xf32>
    %43 = arith.mulf %38, %42 : vector<8x8xf32>
    %44 = vector.extract_strided_slice %20 {offsets = [0, 0], sizes = [8, 8], strides = [1, 1]} : vector<8x32xf32> to vector<8x8xf32>
    %cst_30 = arith.constant dense<0.000000e+00> : vector<8x8xf32>
    %45 = tpu.matmul %43, %44, %cst_30 {dimension_numbers = #tpu.dot_dimension_numbers<[1], [0], [0], [1], [0, 0, 1, 1], [], []>} : vector<8x8xf32>, vector<8x8xf32>, vector<8x8xf32> -> vector<8x8xf32>
    %c0_31 = arith.constant 0 : index
    %c0_32 = arith.constant 0 : index
    %46 = vector.load %arg8[%c0_31, %c0_32] : memref<32x32xf32, #tpu.memory_space<vmem>>, vector<8x32xf32>
    %cst_33 = arith.constant dense<0.000000e+00> : vector<8x32xf32>
    %47 = tpu.matmul %45, %46, %cst_33 {dimension_numbers = #tpu.dot_dimension_numbers<[1], [0], [0], [1], [0, 0, 1, 1], [], []>} : vector<8x8xf32>, vector<8x32xf32>, vector<8x32xf32> -> vector<8x32xf32>
    %48 = arith.addf %28, %47 : vector<8x32xf32>
    %49 = vector.extract_strided_slice %10 {offsets = [0, 8], sizes = [8, 8], strides = [1, 1]} : vector<8x32xf32> to vector<8x8xf32>
    %50 = vector.extract_strided_slice %15 {offsets = [0, 8], sizes = [8, 8], strides = [1, 1]} : vector<8x32xf32> to vector<8x8xf32>
    %cst_34 = arith.constant dense<0.000000e+00> : vector<8x8xf32>
    %51 = tpu.matmul %49, %50, %cst_34 {dimension_numbers = #tpu.dot_dimension_numbers<[1], [1], [0], [0], [0, 0, 1, 0], [], []>} : vector<8x8xf32>, vector<8x8xf32>, vector<8x8xf32> -> vector<8x8xf32>
    %52 = vector.broadcast %27 : vector<1x8xf32> to vector<8x8xf32>
    %53 = arith.addf %51, %52 : vector<8x8xf32>
    %cst_35 = arith.constant dense<0xFF800000> : vector<8xf32>
    %54 = vector.multi_reduction <maximumf>, %53, %cst_35 [1] : vector<8x8xf32> to vector<8xf32>
    %55 = vector.shape_cast %54 : vector<8xf32> to vector<8x1xf32>
    %56 = vector.broadcast %55 : vector<8x1xf32> to vector<8x8xf32>
    %57 = arith.subf %53, %56 : vector<8x8xf32>
    %58 = math.exp %57 : vector<8x8xf32>
    %cst_36 = arith.constant dense<0.000000e+00> : vector<8xf32>
    %59 = vector.multi_reduction <add>, %58, %cst_36 [1] : vector<8x8xf32> to vector<8xf32>
    %60 = vector.shape_cast %59 : vector<8xf32> to vector<8x1xf32>
    %61 = tpu.reciprocal %60 {approx = true} : vector<8x1xf32> -> vector<8x1xf32>
    %62 = vector.broadcast %61 : vector<8x1xf32> to vector<8x8xf32>
    %63 = arith.mulf %58, %62 : vector<8x8xf32>
    %64 = vector.extract_strided_slice %20 {offsets = [0, 8], sizes = [8, 8], strides = [1, 1]} : vector<8x32xf32> to vector<8x8xf32>
    %cst_37 = arith.constant dense<0.000000e+00> : vector<8x8xf32>
    %65 = tpu.matmul %63, %64, %cst_37 {dimension_numbers = #tpu.dot_dimension_numbers<[1], [0], [0], [1], [0, 0, 1, 1], [], []>} : vector<8x8xf32>, vector<8x8xf32>, vector<8x8xf32> -> vector<8x8xf32>
    %c8 = arith.constant 8 : index
    %c0_38 = arith.constant 0 : index
    %66 = vector.load %arg8[%c8, %c0_38] : memref<32x32xf32, #tpu.memory_space<vmem>>, vector<8x32xf32>
    %cst_39 = arith.constant dense<0.000000e+00> : vector<8x32xf32>
    %67 = tpu.matmul %65, %66, %cst_39 {dimension_numbers = #tpu.dot_dimension_numbers<[1], [0], [0], [1], [0, 0, 1, 1], [], []>} : vector<8x8xf32>, vector<8x32xf32>, vector<8x32xf32> -> vector<8x32xf32>
    %68 = arith.addf %48, %67 : vector<8x32xf32>
    %69 = vector.extract_strided_slice %10 {offsets = [0, 16], sizes = [8, 8], strides = [1, 1]} : vector<8x32xf32> to vector<8x8xf32>
    %70 = vector.extract_strided_slice %15 {offsets = [0, 16], sizes = [8, 8], strides = [1, 1]} : vector<8x32xf32> to vector<8x8xf32>
    %cst_40 = arith.constant dense<0.000000e+00> : vector<8x8xf32>
    %71 = tpu.matmul %69, %70, %cst_40 {dimension_numbers = #tpu.dot_dimension_numbers<[1], [1], [0], [0], [0, 0, 1, 0], [], []>} : vector<8x8xf32>, vector<8x8xf32>, vector<8x8xf32> -> vector<8x8xf32>
    %72 = vector.broadcast %27 : vector<1x8xf32> to vector<8x8xf32>
    %73 = arith.addf %71, %72 : vector<8x8xf32>
    %cst_41 = arith.constant dense<0xFF800000> : vector<8xf32>
    %74 = vector.multi_reduction <maximumf>, %73, %cst_41 [1] : vector<8x8xf32> to vector<8xf32>
    %75 = vector.shape_cast %74 : vector<8xf32> to vector<8x1xf32>
    %76 = vector.broadcast %75 : vector<8x1xf32> to vector<8x8xf32>
    %77 = arith.subf %73, %76 : vector<8x8xf32>
    %78 = math.exp %77 : vector<8x8xf32>
    %cst_42 = arith.constant dense<0.000000e+00> : vector<8xf32>
    %79 = vector.multi_reduction <add>, %78, %cst_42 [1] : vector<8x8xf32> to vector<8xf32>
    %80 = vector.shape_cast %79 : vector<8xf32> to vector<8x1xf32>
    %81 = tpu.reciprocal %80 {approx = true} : vector<8x1xf32> -> vector<8x1xf32>
    %82 = vector.broadcast %81 : vector<8x1xf32> to vector<8x8xf32>
    %83 = arith.mulf %78, %82 : vector<8x8xf32>
    %84 = vector.extract_strided_slice %20 {offsets = [0, 16], sizes = [8, 8], strides = [1, 1]} : vector<8x32xf32> to vector<8x8xf32>
    %cst_43 = arith.constant dense<0.000000e+00> : vector<8x8xf32>
    %85 = tpu.matmul %83, %84, %cst_43 {dimension_numbers = #tpu.dot_dimension_numbers<[1], [0], [0], [1], [0, 0, 1, 1], [], []>} : vector<8x8xf32>, vector<8x8xf32>, vector<8x8xf32> -> vector<8x8xf32>
    %c16 = arith.constant 16 : index
    %c0_44 = arith.constant 0 : index
    %86 = vector.load %arg8[%c16, %c0_44] : memref<32x32xf32, #tpu.memory_space<vmem>>, vector<8x32xf32>
    %cst_45 = arith.constant dense<0.000000e+00> : vector<8x32xf32>
    %87 = tpu.matmul %85, %86, %cst_45 {dimension_numbers = #tpu.dot_dimension_numbers<[1], [0], [0], [1], [0, 0, 1, 1], [], []>} : vector<8x8xf32>, vector<8x32xf32>, vector<8x32xf32> -> vector<8x32xf32>
    %88 = arith.addf %68, %87 : vector<8x32xf32>
    %89 = vector.extract_strided_slice %10 {offsets = [0, 24], sizes = [8, 8], strides = [1, 1]} : vector<8x32xf32> to vector<8x8xf32>
    %90 = vector.extract_strided_slice %15 {offsets = [0, 24], sizes = [8, 8], strides = [1, 1]} : vector<8x32xf32> to vector<8x8xf32>
    %cst_46 = arith.constant dense<0.000000e+00> : vector<8x8xf32>
    %91 = tpu.matmul %89, %90, %cst_46 {dimension_numbers = #tpu.dot_dimension_numbers<[1], [1], [0], [0], [0, 0, 1, 0], [], []>} : vector<8x8xf32>, vector<8x8xf32>, vector<8x8xf32> -> vector<8x8xf32>
    %92 = vector.broadcast %27 : vector<1x8xf32> to vector<8x8xf32>
    %93 = arith.addf %91, %92 : vector<8x8xf32>
    %cst_47 = arith.constant dense<0xFF800000> : vector<8xf32>
    %94 = vector.multi_reduction <maximumf>, %93, %cst_47 [1] : vector<8x8xf32> to vector<8xf32>
    %95 = vector.shape_cast %94 : vector<8xf32> to vector<8x1xf32>
    %96 = vector.broadcast %95 : vector<8x1xf32> to vector<8x8xf32>
    %97 = arith.subf %93, %96 : vector<8x8xf32>
    %98 = math.exp %97 : vector<8x8xf32>
    %cst_48 = arith.constant dense<0.000000e+00> : vector<8xf32>
    %99 = vector.multi_reduction <add>, %98, %cst_48 [1] : vector<8x8xf32> to vector<8xf32>
    %100 = vector.shape_cast %99 : vector<8xf32> to vector<8x1xf32>
    %101 = tpu.reciprocal %100 {approx = true} : vector<8x1xf32> -> vector<8x1xf32>
    %102 = vector.broadcast %101 : vector<8x1xf32> to vector<8x8xf32>
    %103 = arith.mulf %98, %102 : vector<8x8xf32>
    %104 = vector.extract_strided_slice %20 {offsets = [0, 24], sizes = [8, 8], strides = [1, 1]} : vector<8x32xf32> to vector<8x8xf32>
    %cst_49 = arith.constant dense<0.000000e+00> : vector<8x8xf32>
    %105 = tpu.matmul %103, %104, %cst_49 {dimension_numbers = #tpu.dot_dimension_numbers<[1], [0], [0], [1], [0, 0, 1, 1], [], []>} : vector<8x8xf32>, vector<8x8xf32>, vector<8x8xf32> -> vector<8x8xf32>
    %c24 = arith.constant 24 : index
    %c0_50 = arith.constant 0 : index
    %106 = vector.load %arg8[%c24, %c0_50] : memref<32x32xf32, #tpu.memory_space<vmem>>, vector<8x32xf32>
    %cst_51 = arith.constant dense<0.000000e+00> : vector<8x32xf32>
    %107 = tpu.matmul %105, %106, %cst_51 {dimension_numbers = #tpu.dot_dimension_numbers<[1], [0], [0], [1], [0, 0, 1, 1], [], []>} : vector<8x8xf32>, vector<8x32xf32>, vector<8x32xf32> -> vector<8x32xf32>
    %108 = arith.addf %88, %107 : vector<8x32xf32>
    %c0_52 = arith.constant 0 : index
    %c0_53 = arith.constant 0 : index
    %109 = vector.load %arg9[%c0_52, %c0_53] : memref<1x32xf32, #tpu.memory_space<vmem>>, vector<1x32xf32>
    %110 = vector.broadcast %109 : vector<1x32xf32> to vector<8x32xf32>
    %111 = arith.addf %108, %110 : vector<8x32xf32>
    %c8_i32 = arith.constant 8 : i32
    %112 = arith.muli %arg1, %c8_i32 : i32
    %113 = tpu.assume_multiple %112, 8 : i32
    %c0_54 = arith.constant 0 : index
    %114 = arith.index_cast %113 : i32 to index
    %c0_55 = arith.constant 0 : index
    %115 = vector.load %arg4[%c0_54, %114, %c0_55] : memref<1x8x32xf32, #tpu.memory_space<vmem>>, vector<1x8x32xf32>
    %116 = vector.shape_cast %115 : vector<1x8x32xf32> to vector<8x32xf32>
    %117 = arith.addf %116, %111 : vector<8x32xf32>
    %cst_56 = arith.constant dense<0.000000e+00> : vector<8xf32>
    %118 = vector.multi_reduction <add>, %117, %cst_56 [1] : vector<8x32xf32> to vector<8xf32>
    %119 = vector.shape_cast %118 : vector<8xf32> to vector<8x1xf32>
    %cst_57 = arith.constant 3.200000e+01 : f32
    %120 = vector.broadcast %cst_57 : f32 to vector<8x1xf32>
    %121 = arith.divf %119, %120 : vector<8x1xf32>
    %122 = vector.broadcast %121 : vector<8x1xf32> to vector<8x32xf32>
    %123 = arith.subf %117, %122 : vector<8x32xf32>
    %124 = arith.mulf %123, %123 : vector<8x32xf32>
    %cst_58 = arith.constant dense<0.000000e+00> : vector<8xf32>
    %125 = vector.multi_reduction <add>, %124, %cst_58 [1] : vector<8x32xf32> to vector<8xf32>
    %126 = vector.shape_cast %125 : vector<8xf32> to vector<8x1xf32>
    %cst_59 = arith.constant 0.0322580636 : f32
    %127 = vector.broadcast %cst_59 : f32 to vector<8x1xf32>
    %128 = arith.mulf %126, %127 : vector<8x1xf32>
    %129 = math.sqrt %128 : vector<8x1xf32>
    %cst_60 = arith.constant 9.99999997E-7 : f32
    %130 = vector.broadcast %cst_60 : f32 to vector<8x1xf32>
    %131 = arith.addf %129, %130 : vector<8x1xf32>
    %132 = tpu.reciprocal %131 : vector<8x1xf32> -> vector<8x1xf32>
    %c0_61 = arith.constant 0 : index
    %c0_62 = arith.constant 0 : index
    %133 = vector.load %arg10[%c0_61, %c0_62] : memref<1x32xf32, #tpu.memory_space<vmem>>, vector<1x32xf32>
    %134 = vector.broadcast %133 : vector<1x32xf32> to vector<8x32xf32>
    %135 = vector.broadcast %132 : vector<8x1xf32> to vector<8x32xf32>
    %136 = arith.mulf %134, %135 : vector<8x32xf32>
    %137 = arith.mulf %123, %136 : vector<8x32xf32>
    %c0_63 = arith.constant 0 : index
    %c0_64 = arith.constant 0 : index
    %138 = vector.load %arg11[%c0_63, %c0_64] : memref<1x32xf32, #tpu.memory_space<vmem>>, vector<1x32xf32>
    %139 = vector.broadcast %138 : vector<1x32xf32> to vector<8x32xf32>
    %140 = arith.addf %137, %139 : vector<8x32xf32>
    %c0_65 = arith.constant 0 : index
    %c0_66 = arith.constant 0 : index
    %c0_67 = arith.constant 0 : index
    %141 = vector.load %arg12[%c0_65, %c0_66, %c0_67] : memref<1x8x32xf32, #tpu.memory_space<vmem>>, vector<1x8x32xf32>
    %142 = vector.shape_cast %141 : vector<1x8x32xf32> to vector<8x32xf32>
    %143 = vector.shape_cast %140 : vector<8x32xf32> to vector<1x8x32xf32>
    tpu.vector_store %arg12[%c0_65, %c0_66, %c0_67], %143 {strides = array<i32>} : memref<1x8x32xf32, #tpu.memory_space<vmem>>, vector<1x8x32xf32>,
    return
  }
  func.func @transform_0(%arg0: i32, %arg1: i32) -> (i32, i32, i32) {
    %c0_i32 = arith.constant 0 : i32
    %c0_i32_0 = arith.constant 0 : i32
    return %arg0, %arg1, %c0_i32 : i32, i32, i32
  }
  func.func @transform_1(%arg0: i32, %arg1: i32) -> (i32, i32, i32) {
    %c0_i32 = arith.constant 0 : i32
    %c0_i32_0 = arith.constant 0 : i32
    %c0_i32_1 = arith.constant 0 : i32
    return %arg0, %c0_i32, %c0_i32_0 : i32, i32, i32
  }
  func.func @transform_2(%arg0: i32, %arg1: i32) -> (i32, i32, i32) {
    %c0_i32 = arith.constant 0 : i32
    %c0_i32_0 = arith.constant 0 : i32
    %c0_i32_1 = arith.constant 0 : i32
    return %arg0, %c0_i32, %c0_i32_0 : i32, i32, i32
  }
  func.func @transform_3(%arg0: i32, %arg1: i32) -> (i32, i32, i32) {
    %c0_i32 = arith.constant 0 : i32
    %c0_i32_0 = arith.constant 0 : i32
    %c0_i32_1 = arith.constant 0 : i32
    return %arg0, %c0_i32, %c0_i32_0 : i32, i32, i32
  }
  func.func @transform_4(%arg0: i32, %arg1: i32) -> (i32, i32) {
    %c0_i32 = arith.constant 0 : i32
    %c0_i32_0 = arith.constant 0 : i32
    %c0_i32_1 = arith.constant 0 : i32
    return %c0_i32, %c0_i32_0 : i32, i32
  }
  func.func @transform_5(%arg0: i32, %arg1: i32) -> (i32, i32) {
    %c0_i32 = arith.constant 0 : i32
    %c0_i32_0 = arith.constant 0 : i32
    %c0_i32_1 = arith.constant 0 : i32
    return %c0_i32, %c0_i32_0 : i32, i32
  }
  func.func @transform_6(%arg0: i32, %arg1: i32) -> (i32, i32) {
    %c0_i32 = arith.constant 0 : i32
    %c0_i32_0 = arith.constant 0 : i32
    %c0_i32_1 = arith.constant 0 : i32
    return %c0_i32, %c0_i32_0 : i32, i32
  }
  func.func @transform_7(%arg0: i32, %arg1: i32) -> (i32, i32) {
    %c0_i32 = arith.constant 0 : i32
    %c0_i32_0 = arith.constant 0 : i32
    %c0_i32_1 = arith.constant 0 : i32
    return %c0_i32, %c0_i32_0 : i32, i32
  }
  func.func @transform_8(%arg0: i32, %arg1: i32) -> (i32, i32) {
    %c0_i32 = arith.constant 0 : i32
    %c0_i32_0 = arith.constant 0 : i32
    %c0_i32_1 = arith.constant 0 : i32
    return %c0_i32, %c0_i32_0 : i32, i32
  }
  func.func @transform_9(%arg0: i32, %arg1: i32) -> (i32, i32) {
    %c0_i32 = arith.constant 0 : i32
    %c0_i32_0 = arith.constant 0 : i32
    %c0_i32_1 = arith.constant 0 : i32
    return %c0_i32, %c0_i32_0 : i32, i32
  }
  func.func @transform_10(%arg0: i32, %arg1: i32) -> (i32, i32, i32) {
    %c0_i32 = arith.constant 0 : i32
    %c0_i32_0 = arith.constant 0 : i32
    return %arg0, %arg1, %c0_i32 : i32, i32, i32
  }
}

</mosaic_0001>

<bundles_post_ra>
// kernel: tpu_custom_call.1
= control target key start
LH: loop header
LB: loop body
LE: loop exit
PB: predicated region body
PF: predicated region fallthrough
CT: control target
= control target key end

     0   :  { %s3066_s0 = inlined_call_operand.hbm [shape: f32[2,8,32], index: 0, kind: input, shape index: {}]   ;;  %s3067_s1 = inlined_call_operand.hbm [shape: f32[2,8,32], index: 1, kind: input, shape index: {}]   ;;  %s3068_s2 = inlined_call_operand.hbm [shape: f32[2,8,32], index: 2, kind: input, shape index: {}]   ;;  %s3069_s3 = inlined_call_operand.vmem [shape: f32[2,1,8], index: 3, kind: input, shape index: {}]   ;;  %s3070_s4 = inlined_call_operand.hbm [shape: f32[32,96], index: 4, kind: input, shape index: {}]   ;;  %s3071_s5 = inlined_call_operand.vmem [shape: f32[1,96], index: 5, kind: input, shape index: {}]   ;;  %s3072_s6 = inlined_call_operand.hbm [shape: f32[32,32], index: 6, kind: input, shape index: {}]   ;;  %s3073_s7 = inlined_call_operand.vmem [shape: f32[1,32], index: 7, kind: input, shape index: {}]   ;;  %s3074_s8 = inlined_call_operand.vmem [shape: f32[1,32], index: 8, kind: input, shape index: {}]   ;;  %s3075_s9 = inlined_call_operand.vmem [shape: f32[1,32], index: 9, kind: input, shape index: {}]   ;;  %s3076_s10 = inlined_call_operand.hbm [shape: f32[2,8,32], index: 10, kind: output, shape index: {}]  }
   0x1   :  { %3098 = sst [smem:[#allocation22_spill]] %s3067_s1 }
   0x2   :  { %3099 = sst [smem:[#allocation23_spill]] %s3070_s4 }
   0x3   :  { %3100 = sst [smem:[#allocation24_spill]] %s3072_s6 }
   0x4   :  { %3101 = sst [smem:[#allocation25_spill]] %s3075_s9 }
   0x5   :  { %3102 = sst [smem:[#allocation26_spill]] %s3076_s10 }
   0x6   :  { %15 = vsyncpa [#allocation3], 0 }
   0x7   :  { %17 = vsyncpa [#allocation3 + $0x1], 0 }
   0x8   :  { %18 = vsyncpa [#allocation6], 0 }
   0x9   :  { %20 = vsyncpa [#allocation6 + $0x1], 0 }
   0xa   :  { %21 = vsyncpa [#allocation9], 0 }
   0xb   :  { %22 = vsyncpa [#allocation4], 0 }
   0xc   :  { %24 = vsyncpa [#allocation4 + $0x1], 0  ;;  %s2604_s13 = smov 0   ;;  %s2606_s14 = smov 0  }
   0xd   :  { %s2608_s15 = smov 0   ;;  %s2610_s16 = smov 0  }
   0xe   :  { %s2612_s17 = smov 0   ;;  %s2614_s18 = smov 0  }
   0xf LB: > { %3103 = sst [smem:[#allocation16_spill]] %s2511_s13  ;;  %s2635_s19 = sadd.s32 4294967295, %s2531_s18   ;;  %s2531_s18 = sphi %s2614_s18, %s30_s18   ;;  %s2527_s17 = sphi %s2612_s17, %s3144_s17   ;;  %s2523_s16 = sphi %s2610_s16, %s3143_s16   ;;  %s2519_s15 = sphi %s2608_s15, %s3147_s15   ;;  %s2515_s14 = sphi %s2606_s14, %s3146_s14   ;;  %s2511_s13 = sphi %s2604_s13, %s3145_s13  }
  0x10   : > { %3104 = sst [smem:[#allocation17_spill]] %s2527_s17  ;;  %s1957_s20 = sadd.s32 4294967294, %s2531_s18  }
  0x11   : > { %3105 = sst [smem:[#allocation18_spill]] %s2531_s18  ;;  %p64_p0 = scmp.ne.s32.totalorder %s2515_s14, %s2511_s13 }
  0x12   : > { %p3078_p1 = scmp.eq.s32.totalorder %s2635_s19, 0  ;;  %p300_p3 = scmp.eq.s32.totalorder %s1957_s20, 1 }
  0x13   : > { %p1958_p5 = scmp.ge.s32.totalorder %s2531_s18, 1  ;;  %p307_p7 = scmp.lt.s32.totalorder %s2531_s18, 3 }
  0x14   : > { %p2644_p4 = por %p3078_p1, %p64_p0  ;;  %p2649_p6 = por %p300_p3, %p64_p0 }
  0x15   : > { %p2654_p8 = pnand %p1958_p5, %p307_p7  ;;  %s2533_s24 = smov [#allocation8]  }
  0x16   : > { %s3106_s21 = scalar_select %p2644_p4, 1, 0 }
  0x17   : > { %s3107_s22 = scalar_select %p2649_p6, 1, 0 }
  0x18   : > { %s3109_s23 = scalar_select %p2654_p8, 1, 0 }
  0x19   : > { %3108 = sst [smem:[#allocation19_spill]] %s3107_s22  ;;  %s319_s25 = sshll.u32 %s2533_s24, 4  ;;  %s320_s25 = int_to_ptr.vmem [resolvable:$true] %s319_s25 }
  0x1a   : > { %p2168_p9 = pneg %p2654_p8  ;;  %s42_s27 = sadd.s32 1, %s2527_s17 }
  0x1b   : > { %s3111_s4 = sld [smem:[#allocation23_spill]] }
  0x1c   : > { %p2663_p11 = pnand %p2168_p9, %p3078_p1 }
  0x1e   : > { %s3110_s26 = scalar_select %p2663_p11, 1, 0 }
  0x1f   : > { %p3090_p13 = pneg %p2663_p11 }
  0x21   : > { %s2295_s30 = scalar_lea.hbm %s3111_s4, 512 }
  0x22   : > { %p2296_p12 = scmp.ne.s32.totalorder %s3111_s4, %s2295_s30  ;;  %p2302_p5 = scmp.lt.u32.totalorder %s2295_s30, %s3111_s4 }
  0x24   : > { %p2298_p0 = pnand %p3090_p13, %p2296_p12 }
  0x26   : > { %p2299_p3 = pneg %p2298_p0 }
  0x28   : > { %p2304_p7 = pnand %p2302_p5, %p2299_p3 }
  0x2a   : > { %2307 = shalt.err (!%p2304_p7)
}
  0x2b   : > { %s2308_s22 = scalar_lea.vmem %s320_s25, 512  ;;  %p2316_p2 = scmp.lt.s32.totalorder %s320_s25, %s320_s25 }
  0x2c   : > { %p2309_p9 = scmp.ne.s32.totalorder %s320_s25, %s2308_s22  ;;  %p2317_p6 = scmp.lt.s32.totalorder %s2308_s22, %s2308_s22 }
  0x2e   : > { %p2311_p10 = pnand %p2309_p9, %p3090_p13  ;;  %p2318_p4 = por %p2317_p6, %p2316_p2 }
  0x30   : > { %p2312_p1 = pneg %p2311_p10 }
  0x32   : > { %p2319_p8 = pnand %p2318_p4, %p2312_p1 }
  0x34   : > { %2322 = shalt.err (!%p2319_p8)
}
  0x35   : > { %s3081_s28 = smov 128   ;;  %s3082_s29 = smov 8  }
  0x36   : > { %2171 = dma.hbm_to_vmem [thread:$0]  (!%p2663_p11), %s3111_s4, 512, %s320_s25, [#allocation9], %s3081_s28, %s3081_s28, %s3082_s29  }
  0x37   : > { %p44_p1 = scmp.ge.s32.totalorder %s42_s27, 2  ;;  %s51_s11 = sadd.s32 1, %s2519_s15 }
  0x38   : > { %p58_p2 = scmp.ne.s32.totalorder %s2519_s15, %s2515_s14  ;;  %p59_p4 = scmp.eq.s32.totalorder %s2531_s18, 0 }
  0x39   : > { %s3149_s27 = smov (%p44_p1, %s42_s27), 0  ;;  %p3113_p8 = scmp.eq.s32.totalorder %s2635_s19, 1 }
  0x3a   : > { %3112 = sst [smem:[#allocation20_spill]] %s3149_s27  ;;  %p60_p6 = por %p59_p4, %p58_p2 }
  0x3b   : > { %p2701_p10 = por %p3113_p8, %p58_p2  ;;  %s46_s20 = ssub.s32 %s2527_s17, %s3149_s27 }
  0x3c   : > { %p2191_p12 = scmp.lt.s32.totalorder %s2531_s18, 2  ;;  %p49_p0 = scmp.eq.s32.totalorder %s46_s20, 0 }
  0x3d   : > { %s3114_s12 = scalar_select %p2701_p10, 1, 0 }
  0x3e   : > { %s3084_s24 = sand.u32 1, %s2519_s15   ;;  %s2714_s22 = sshll.u32 %s2527_s17, 7 }
  0x3f   : > { %s2711_s25 = sshll.u32 %s3084_s24, 3  ;;  %p2719_p3 = pnand %p2191_p12, %p60_p6 }
  0x40   : > { %s2717_s30 = scalar_select %p49_p0, %s2519_s15, %s51_s11  }
  0x41   : > { %s3116_s28 = scalar_select %p2719_p3, 1, 0 }
  0x42   : > { %3115 = sst [smem:[#allocation21_spill]] %s2717_s30  ;;  %s377_s29 = sand.u32 1, %s2531_s18  }
  0x43   : > { %s3117_s1 = sld [smem:[#allocation22_spill]]  ;;  %s381_s24 = scalar_lea.vmem [#allocation5], %s2711_s25 }
  0x44   : > { %s388_s17 = sshll.u32 %s381_s24, 4  ;;  %s2536_s11 = smov [#allocation10]   ;;  %s2731_s17 = int_to_ptr.vmem [resolvable:$true] %s388_s17 }
  0x45   : > { %s2733_s30 = sshll.u32 %s2536_s11, 4  ;;  %s2735_s13 = scalar_lea.sflag [#allocation6], %s377_s29  ;;  %s336_s30 = int_to_ptr.vmem [resolvable:$true] %s2733_s30 }
  0x46   : > { %p2741_p7 = pneg %p2719_p3 }
  0x48   : > { %s3118_s4 = scalar_select %p2741_p7, 1, 0 }
  0x49   : > { %s2728_s20 = scalar_lea.hbm %s3117_s1, %s2714_s22  ;;  %s2328_s18 = scalar_lea.hbm %s3117_s1, 256 }
  0x4a   : > { %s2323_s10 = scalar_lea.hbm %s2728_s20, 128  ;;  %p2329_p2 = scmp.lt.u32.totalorder %s2728_s20, %s3117_s1 }
  0x4b   : > { %p2324_p5 = scmp.ne.s32.totalorder %s2728_s20, %s2323_s10  ;;  %p2330_p4 = scmp.lt.u32.totalorder %s2328_s18, %s2323_s10 }
  0x4c   : > { %p2332_p8 = scmp.lt.u32.totalorder %s2323_s10, %s2728_s20 }
  0x4d   : > { %p2326_p9 = pnand %p2741_p7, %p2324_p5  ;;  %p2331_p6 = por %p2330_p4, %p2329_p2 }
  0x4f   : > { %p2327_p1 = pneg %p2326_p9  ;;  %p2333_p12 = por %p2332_p8, %p2331_p6 }
  0x51   : > { %p2334_p0 = pnand %p2333_p12, %p2327_p1 }
  0x53   : > { %2337 = shalt.err (!%p2334_p0)
}
  0x54   : > { %s2338_s29 = scalar_lea.vmem %s2731_s17, 128  ;;  %s2537_s27 = smov [#allocation5]  }
  0x55   : > { %p2339_p5 = scmp.ne.s32.totalorder %s2731_s17, %s2338_s29  ;;  %s2343_s24 = sshll.u32 %s2537_s27, 4  ;;  %s2344_s24 = int_to_ptr.vmem [resolvable:$false] %s2343_s24 }
  0x56   : > { %s2345_s9 = scalar_lea.vmem %s2344_s24, 256  ;;  %p2346_p10 = scmp.lt.s32.totalorder %s2731_s17, %s2344_s24 }
  0x57   : > { %p2341_p9 = pnand %p2339_p5, %p2741_p7  ;;  %p2347_p11 = scmp.lt.s32.totalorder %s2345_s9, %s2338_s29 }
  0x59   : > { %p2342_p13 = pneg %p2341_p9  ;;  %p2348_p2 = por %p2347_p11, %p2346_p10 }
  0x5b   : > { %p2349_p4 = pnand %p2348_p2, %p2342_p13 }
  0x5d   : > { %2352 = shalt.err (!%p2349_p4)
}
  0x5e   : > { %2181 = dma.hbm_to_vmem [thread:$0]  (!%p2719_p3), %s2728_s20, 128, %s2731_s17, %s2735_s13  }
  0x5f   : > { %s3119_s6 = sld [smem:[#allocation24_spill]]  ;;  %p3120_p11 = scmp.ne.s32.totalorder %s3110_s26, 0 }
  0x61   : > { %p3121_p13 = pneg %p3120_p11 }
  0x65   : > { %s2353_s11 = scalar_lea.hbm %s3119_s6, 512 }
  0x66   : > { %p2354_p1 = scmp.ne.s32.totalorder %s3119_s6, %s2353_s11  ;;  %p2360_p8 = scmp.lt.u32.totalorder %s2353_s11, %s3119_s6 }
  0x68   : > { %p2356_p10 = pnand %p2354_p1, %p3121_p13 }
  0x6a   : > { %p2357_p6 = pneg %p2356_p10 }
  0x6c   : > { %p2362_p12 = pnand %p2360_p8, %p2357_p6 }
  0x6e   : > { %2365 = shalt.err (!%p2362_p12)
}
  0x6f   : > { %s2366_s17 = scalar_lea.vmem %s336_s30, 512  ;;  %p3122_p5 = pmov %p3121_p13 }
  0x70   : > { %p2367_p0 = scmp.ne.s32.totalorder %s336_s30, %s2366_s17  ;;  %p2374_p4 = scmp.lt.s32.totalorder %s336_s30, %s336_s30 }
  0x71   : > { %p2375_p3 = scmp.lt.s32.totalorder %s2366_s17, %s2366_s17 }
  0x72   : > { %p2369_p9 = pnand %p2367_p0, %p3122_p5 }
  0x73   : > { %p2376_p7 = por %p2375_p3, %p2374_p4 }
  0x74   : > { %p2370_p2 = pneg %p2369_p9 }
  0x76   : > { %p2377_p1 = pnand %p2376_p7, %p2370_p2 }
  0x78   : > { %2380 = shalt.err (!%p2377_p1)
}
  0x79   : > { %s3123_s1 = smov 8   ;;  %s3124_s20 = smov 128  }
  0x7a   : > { %2174 = dma.hbm_to_vmem [thread:$0]  (!%p3120_p11), %s3119_s6, 512, %s336_s30, [#allocation9], %s3124_s20, %s3124_s20, %s3123_s1  }
  0x7b   : > { %s2793_s27 = scalar_lea.hbm %s3066_s0, %s2714_s22  ;;  %s362_s26 = scalar_lea.vmem [#allocation2], %s2711_s25 }
  0x7c   : > { %s370_s29 = sshll.u32 %s362_s26, 4  ;;  %s2802_s9 = scalar_lea.hbm %s3068_s2, %s2714_s22  ;;  %s2796_s29 = int_to_ptr.vmem [resolvable:$true] %s370_s29 }
  0x7d   : > { %s3125_s10 = sand.u32 1, %s2519_s15   ;;  %s2381_s1 = scalar_lea.hbm %s2793_s27, 128 }
  0x7e   : > { %s359_s30 = scalar_lea.sflag [#allocation3], %s3125_s10  ;;  %p2382_p3 = scmp.ne.s32.totalorder %s2793_s27, %s2381_s1 }
  0x7f   : > { %p3126_p7 = scmp.ne.s32.totalorder %s3118_s4, 0  ;;  %s2386_s11 = scalar_lea.hbm %s3066_s0, 256 }
  0x80   : > { %p2387_p10 = scmp.lt.u32.totalorder %s2793_s27, %s3066_s0  ;;  %p2388_p6 = scmp.lt.u32.totalorder %s2386_s11, %s2381_s1 }
  0x81   : > { %p2384_p11 = pnand %p2382_p3, %p3126_p7  ;;  %p2390_p12 = scmp.lt.u32.totalorder %s2381_s1, %s2793_s27 }
  0x82   : > { %p2389_p8 = por %p2388_p6, %p2387_p10 }
  0x83   : > { %p2385_p13 = pneg %p2384_p11 }
  0x84   : > { %p2391_p0 = por %p2390_p12, %p2389_p8 }
  0x86   : > { %p2392_p5 = pnand %p2391_p0, %p2385_p13 }
  0x88   : > { %2395 = shalt.err (!%p2392_p5)
}
  0x89   : > { %s2396_s22 = scalar_lea.vmem %s2796_s29, 128  ;;  %s2538_s24 = smov [#allocation2]  }
  0x8a   : > { %p2397_p9 = scmp.ne.s32.totalorder %s2796_s29, %s2396_s22  ;;  %s2401_s17 = sshll.u32 %s2538_s24, 4  ;;  %s2402_s17 = int_to_ptr.vmem [resolvable:$false] %s2401_s17 }
  0x8b   : > { %s2403_s6 = scalar_lea.vmem %s2402_s17, 256  ;;  %p2404_p1 = scmp.lt.s32.totalorder %s2796_s29, %s2402_s17 }
  0x8c   : > { %p2399_p2 = pnand %p2397_p9, %p3126_p7  ;;  %p2405_p3 = scmp.lt.s32.totalorder %s2403_s6, %s2396_s22 }
  0x8e   : > { %p2400_p4 = pneg %p2399_p2  ;;  %p2406_p11 = por %p2405_p3, %p2404_p1 }
  0x90   : > { %p2407_p10 = pnand %p2406_p11, %p2400_p4 }
  0x92   : > { %2410 = shalt.err (!%p2407_p10)
}
  0x93   : > { %p3127_p13 = scmp.ne.s32.totalorder %s3116_s28, 0  ;;  %s399_s10 = scalar_lea.vmem [#allocation7], %s2711_s25 }
  0x94   : > { %s406_s1 = sshll.u32 %s399_s10, 4  ;;  %s2411_s20 = scalar_lea.hbm %s2802_s9, 128  ;;  %s407_s1 = int_to_ptr.vmem [resolvable:$true] %s406_s1 }
  0x95   : > { %2178 = dma.hbm_to_vmem [thread:$0]  (!%p3127_p13), %s2793_s27, 128, %s2796_s29, %s359_s30  }
  0x96   : > { %p2412_p6 = scmp.ne.s32.totalorder %s2802_s9, %s2411_s20  ;;  %s2416_s26 = scalar_lea.hbm %s3068_s2, 256 }
  0x97   : > { %p2417_p0 = scmp.lt.u32.totalorder %s2802_s9, %s3068_s2  ;;  %p2418_p5 = scmp.lt.u32.totalorder %s2416_s26, %s2411_s20 }
  0x98   : > { %p2414_p8 = pnand %p2412_p6, %p3126_p7  ;;  %p2420_p2 = scmp.lt.u32.totalorder %s2411_s20, %s2802_s9 }
  0x99   : > { %p2419_p9 = por %p2418_p5, %p2417_p0 }
  0x9a   : > { %p2415_p12 = pneg %p2414_p8 }
  0x9b   : > { %p2421_p4 = por %p2420_p2, %p2419_p9 }
  0x9d   : > { %p2422_p1 = pnand %p2421_p4, %p2415_p12 }
  0x9f   : > { %2425 = shalt.err (!%p2422_p1)
}
  0xa0   : > { %s2426_s25 = scalar_lea.vmem %s407_s1, 128  ;;  %s2539_s27 = smov [#allocation7]  }
  0xa1   : > { %p2427_p3 = scmp.ne.s32.totalorder %s407_s1, %s2426_s25  ;;  %s2431_s29 = sshll.u32 %s2539_s27, 4  ;;  %s2432_s29 = int_to_ptr.vmem [resolvable:$false] %s2431_s29 }
  0xa2   : > { %s2433_s30 = scalar_lea.vmem %s2432_s29, 256  ;;  %p2434_p6 = scmp.lt.s32.totalorder %s407_s1, %s2432_s29 }
  0xa3   : > { %p2429_p11 = pnand %p2427_p3, %p3126_p7  ;;  %p2435_p8 = scmp.lt.s32.totalorder %s2433_s30, %s2426_s25 }
  0xa5   : > { %p2430_p10 = pneg %p2429_p11  ;;  %p2436_p13 = por %p2435_p8, %p2434_p6 }
  0xa7   : > { %p2437_p0 = pnand %p2436_p13, %p2430_p10 }
  0xa9   : > { %2440 = shalt.err (!%p2437_p0)
}
  0xaa   : > { %p3128_p5 = scmp.ne.s32.totalorder %s3116_s28, 0  ;;  %p3129_p12 = scmp.ne.s32.totalorder %s3109_s23, 0 }
  0xab   : > { %s2849_s4 = sand.u32 (!%p3129_p12), 1, %s2515_s14   ;;  %p3130_p7 = scmp.ne.s32.totalorder (!%p3129_p12), %s3106_s21, 0 }
  0xac   : > { %2184 = dma.hbm_to_vmem [thread:$0]  (!%p3128_p5), %s2802_s9, 128, %s407_s1, %s2735_s13  }
  0xad   : > { %421 = sbr.rel (%p3129_p12) target bundleno = 3224 (0xc98), region = 60  ;;  %s2852_s17 = sshll.u32 (!%p3129_p12), %s2849_s4, 3 }
  0xae   : > { %s424_s6 = scalar_lea.sflag (!%p3129_p12), [#allocation3], %s2849_s4  ;;  %s427_s10 = scalar_lea.vmem (!%p3129_p12), [#allocation2], %s2852_s17 }
  0xb4   : > { %2494 = dma.done.wait (%p3130_p7), %s424_s6, 128  }
  0xb5   : > { %2496 = vsyncadd (%p3130_p7), %s424_s6, 4294967168  ;;  %s432_s13 = sand.u32 1, %s2635_s19   ;;  %s436_s28 = scalar_lea.vmem [#allocation5], %s2852_s17 }
  0xb6   : > { %s433_s23 = scalar_lea.sflag [#allocation6], %s432_s13 }
  0xb7   : > { %2498 = dma.done.wait (%p3130_p7), %s433_s23, 256  }
  0xb8   : > { %2500 = vsyncadd (%p3130_p7), %s433_s23, 4294967040  ;;  %s445_s9 = scalar_lea.vmem [#allocation7], %s2852_s17  ;;  %p3131_p13 = scmp.eq.s32.totalorder %s2635_s19, 0 }
  0xba   : > { %2502 = dma.done.wait (%p3131_p13), [#allocation9], 1024   ;;  %p3132_p9 = pmov %p3131_p13 }
  0xbb   : > { %v2540_v0 = vmov 0.0|0.0   ;;  %vm2541_vm0 = vmmov 0   ;;  %v2542_v1 = vmov 0.0   ;;  %v509_v2 = vld [vmem:[#allocation8] sm:$0xff]  ;;  %v510_v3 = vld [vmem:[#allocation8 + $0x8] sm:$0xff]  ;;  %v511_v4 = vld [vmem:[#allocation8 + $0x10] sm:$0xff]  ;;  %v778_v41 = vlaneseq }
  0xbc   : > { %2504 = vsyncadd (%p3132_p9), [#allocation9], 4294966272  ;;  %2140 = vmatprep.subr.bf16.mxu1 %v2540_v0  ;;  %2134 = vmatprep.subr.bf16.mxu0 %v2540_v0  ;;  %v2255_v5 = vpack.i.bf16 %v510_v3, %v509_v2  ;;  %v512_v6 = vld [vmem:[#allocation8 + $0x18] sm:$0xff]  ;;  %v2135_v7 = vpack.c.bf16 %v510_v3, %v509_v2  ;;  %v2878_v8 = vld [vmem:[%s3071_s5] ss:$0 sm:$0xff]  ;;  %s2543_s1 = smov 96  }
  0xbd   : > { %2060 = vmatprep.mubr.msk.f32.mxu1 %vm2541_vm0, %v2542_v1  ;;  %2049 = vmatprep.mubr.msk.f32.mxu0 %vm2541_vm0, %v2542_v1  ;;  %v2260_v9 = vpack.i.bf16 %v512_v6, %v511_v4  ;;  %v2138_v10 = vpack.c.bf16 %v512_v6, %v511_v4  ;;  %v506_v11 = vld [vmem:[%s427_s10] sm:$0xff]  ;;  %s2544_s20 = smov 64   ;;  %vm520_vm1 = vcmask 261120   ;;  %v507_v20 = vld [vmem:[%s436_s28] sm:$0xff]  ;;  %s2545_s18 = smov 120   ;;  %vm783_vm2 = vcmask 64512  }
  0xbe   : > { %2256 = vrot.lane.b32.xlu0 %v2255_v5, %s2543_s1  ;;  %2136 = vmatpush3.bf16.msra.mxu0 %v2135_v7  ;;  %v2902_v33 = vld [vmem:[%s445_s9] sm:$0xff]  ;;  %p503_p2 = scmp.lt.s32.totalorder %s2523_s16, 1  ;;  %v779_v43 = vshrl.u32 %v778_v41, 7  ;;  %s2546_s25 = smov 112   ;;  %v1111_v7 = vld [vmem:[#allocation10 + $0x8] sm:$0xff] }
  0xbf   : > { %2137 = vmatprep.subr.bf16.mxu0 %v2540_v0  ;;  %610 = vrot.lane.b32.xlu1 %v2878_v8, %s2543_s1  ;;  %s2547_s27 = smov 104   ;;  %s3133_s28 = sld [smem:[#allocation25_spill]] }
  0xc0   : > { %s504_s11 = scalar_select %p503_p2, %s2523_s16, 1  ;;  %v780_v44 = vsub.s32 0, %v779_v43 }
  0xc1   : > { %s1999_s9 = sshll.u32 %s2523_s16, 7  ;;  %s502_s19 = scalar_lea.vmem [#allocation11], %s2852_s17 }
  0xc2   : > { %2261 = vrot.lane.b32.xlu0 %v2260_v9, %s2543_s1  ;;  %2139 = vmatpush3.bf16.msra.mxu0 %v2138_v10  ;;  %s505_s24 = scalar_lea.vmem %s3069_s3, %s504_s11  ;;  %s1803_s21 = sshll.u32 %s502_s19, 4  ;;  %s3018_s21 = int_to_ptr.vmem [resolvable:$true] %s1803_s21 }
  0xc3   : > { %2266 = vrot.lane.b32.xlu1 %v2255_v5, %s2544_s20  ;;  %2146 = vmatprep.subr.bf16.mxu0 %v2540_v0  ;;  %v774_v42 = vld [vmem:[%s505_s24] sm:$0x1]  ;;  %s1789_s22 = scalar_lea.sflag [#allocation4], %s2849_s4  ;;  %s2441_s24 = scalar_lea.vmem %s3018_s21, 128 }
  0xc4   : > { %vm775_vm3 = vcmp.eq.f32.partialorder %v774_v42, 0.0  ;;  %p2442_p4 = scmp.ne.s32.totalorder %s3018_s21, %s2441_s24  ;;  %p3136_p1 = scmp.ne.s32.totalorder %s3114_s12, 0 }
  0xc5   : > { %2050 = vmatmul.mubr.msk.f32.vlgmr.msra.gmra.mrb[0].mxu0 %vm520_vm1, %v506_v11  ;;  %v776_v45 = vsel %vm775_vm3, -1e+09, %v2542_v1  ;;  %s2548_s16 = smov [#allocation11]  }
  0xc6   : > { %2271 = vrot.lane.b32.xlu0 %v2260_v9, %s2544_s20  ;;  %2071 = vmatprep.mubr.msk.f32.mxu0 %vm2541_vm0, %v2542_v1  ;;  %v2930_v46 = vrot.slane %v776_v45, %v780_v44  ;;  %p2443_p3 = pnand %p2442_p4, %p3136_p1  ;;  %s2445_s17 = sshll.u32 %s2548_s16, 4  ;;  %s2446_s17 = int_to_ptr.vmem [resolvable:$false] %s2445_s17 }
  0xc7   : > { %p2448_p10 = scmp.lt.s32.totalorder %s3018_s21, %s2446_s17 }
  0xc8   : > { %p2444_p11 = pneg %p2443_p3 }
 0x130   : > { %v2257_v12 = vpop.permute.xlu0 %2256 }
 0x131   : > { %v2259_v13 = vunpack.i.h.bf16 %v2257_v12  ;;  %v2258_v14 = vunpack.i.l.bf16 %v2257_v12  ;;  %v611_v21 = vpop.permute.xlu1 %610  ;;  %v944_v12 = vld [vmem:[#allocation10] sm:$0xff] }
 0x133   : > { %v2141_v15 = vpack.c.bf16 %v2259_v13, %v2258_v14 }
 0x134   : > { %v2262_v16 = vpop.permute.xlu0 %2261 }
 0x135   : > { %v2264_v17 = vunpack.i.h.bf16 %v2262_v16  ;;  %v2263_v18 = vunpack.i.l.bf16 %v2262_v16  ;;  %2142 = vmatpush3.bf16.msra.mxu1 %v2141_v15  ;;  %v2267_v22 = vpop.permute.xlu1 %2266 }
 0x136   : > { %2143 = vmatprep.subr.bf16.mxu1 %v2540_v0  ;;  %v2269_v24 = vunpack.i.h.bf16 %v2267_v22  ;;  %v2268_v25 = vunpack.i.l.bf16 %v2267_v22 }
 0x137   : > { %v2144_v19 = vpack.c.bf16 %v2264_v17, %v2263_v18 }
 0x138   : > { %v2272_v23 = vpop.permute.xlu0 %2271  ;;  %v2147_v29 = vpack.c.bf16 %v2269_v24, %v2268_v25 }
 0x139   : > { %2145 = vmatpush3.bf16.msra.mxu1 %v2144_v19  ;;  %v2274_v26 = vunpack.i.h.bf16 %v2272_v23  ;;  %v2273_v27 = vunpack.i.l.bf16 %v2272_v23 }
 0x13a   : > { %2074 = vmatprep.subr.mxu1 %v2542_v1  ;;  %2148 = vmatpush3.bf16.msra.mxu0 %v2147_v29 }
 0x13b   : > { %v2150_v32 = vpack.c.bf16 %v2274_v26, %v2273_v27  ;;  %2149 = vmatprep.subr.bf16.mxu0 %v2540_v0 }
 0x13c   : > { %2061 = vmatmul.mubr.msk.f32.vlgmr.msra.gmra.mrb[0].mxu1 %vm520_vm1, %v507_v20 }
 0x13d   : > { %2076 = vmatprep.mubr.msk.f32.mxu1 %vm2541_vm0, %v2542_v1 }
 0x13e   : > { %2151 = vmatpush3.bf16.msra.mxu0 %v2150_v32 }
 0x13f   : > { %2084 = vmatprep.subr.mxu0 %v2542_v1 }
 0x141   : > { %2072 = vmatmul.mubr.msk.f32.vlgmr.msra.gmra.mrb[2].mxu0 %vm520_vm1, %v2902_v33 }
 0x142   : > { %2086 = vmatprep.mubr.msk.f32.mxu0 %vm2541_vm0, %v2542_v1 }
 0x198   : > { %v590_v28 = vpop.f32.mrb[0].mxu0 }
 0x199   : > { %v2895_v30 = vadd.f32 %v2878_v8, %v590_v28  ;;  %v2051_v31 = vpop.f32.mrb[1].mxu0 }
 0x19b   : > { %945 = vrot.lane.b32.xlu0 %v2895_v30, %s2545_s18 }
 0x20d   : > { %v946_v38 = vpop.permute.xlu0 %945 }
 0x20f   : > { %v682_v34 = vpop.f32.mrb[0].mxu1 }
 0x210   : > { %v2908_v35 = vadd.f32 %v682_v34, %v611_v21  ;;  %v2062_v36 = vpop.f32.mrb[1].mxu1 }
 0x212   : > { %947 = vrot.lane.b32.xlu1 %v2908_v35, %s2545_s18  ;;  %2075 = vmatpush3.xpose.msk.msra.mxu1 %vm783_vm2, %v2908_v35 }
 0x213   : > { %2079 = vmatprep.subr.mxu1 %v2542_v1 }
 0x214   : > { %v770_v39 = vpop.f32.mrb[2].mxu0 }
 0x215   : > { %2077 = vmatmul.mubr.msk.f32.vlgmr.msra.gmra.mrb[2].mxu1 %vm783_vm2, %v2895_v30  ;;  %v2073_v40 = vpop.f32.mrb[3].mxu0 }
 0x216   : > { %2081 = vmatprep.mubr.msk.f32.mxu1 %vm2541_vm0, %v2542_v1  ;;  %v1423_v40 = vld [vmem:[#allocation10 + $0x10] sm:$0xff] }
 0x284   : > { %v948_v37 = vpop.permute.xlu1 %947 }
 0x285   : > { %2085 = vmatpush3.xpose.msk.msra.mxu0 %vm783_vm2, %v948_v37 }
 0x286   : > { %2094 = vmatprep.subr.mxu0 %v2542_v1 }
 0x288   : > { %2087 = vmatmul.mubr.msk.f32.vlgmr.msra.gmra.mrb[4].mxu0 %vm783_vm2, %v946_v38 }
 0x289   : > { %2096 = vmatprep.mubr.msk.f32.mxu0 %vm2541_vm0, %v2542_v1  ;;  %2095 = vmatpush3.msra.mxu0 %v1111_v7 }
 0x28a   : > { %2104 = vmatprep.subr.mxu0 %v2542_v1 }
 0x2e8   : > { %v856_v47 = vpop.f32.mrb[2].mxu1 }
 0x2e9   : > { %v857_v48 = vadd.f32 %v856_v47, %v2930_v46  ;;  %v2078_v49 = vpop.f32.mrb[3].mxu1 }
 0x2eb   : > { %v860_v50 = vsel %vm783_vm2, %v857_v48, -inf }
 0x2ec   : > { %861 = vmax.xlane.f32.xlu1 %v860_v50 }
 0x35b   : > { %v1019_v51 = vpop.f32.mrb[4].mxu0 }
 0x35c   : > { %v1020_v52 = vadd.f32 %v1019_v51, %v2930_v46  ;;  %v2088_v53 = vpop.f32.mrb[5].mxu0 }
 0x35e   : > { %v1023_v54 = vsel %vm783_vm2, %v1020_v52, -inf }
 0x35f   : > { %1024 = vmax.xlane.f32.xlu0 %v1023_v54 }
 0x375   : > { %698 = vrot.lane.b32.xlu0 %v2878_v8, %s2544_s20 }
 0x379   : > { %v862_v55 = vpop.xlane.xlu1 %861  ;;  %1260 = vrot.lane.b32.xlu0 %v2908_v35, %s2546_s25 }
 0x37a   : > { %v863_v56 = vsub.f32 %v857_v48, %v862_v55 }
 0x37c   : > { %v864_v57 = vmul.f32 1.442695, %v863_v56 }
 0x37d   : > { %1258 = vrot.lane.b32.xlu0 %v2895_v30, %s2546_s25 }
 0x37e   : > { %2275 = vpow2.f32 %v864_v57 }
 0x388   : > { %v2276_v58 = vpop.eup %2275 }
 0x389   : > { %v866_v59 = vsel %vm783_vm2, %v2276_v58, 0.0 }
 0x38a   : > { %867 = vadd.xlane.f32.xlu1 %v866_v59 }
 0x3ec   : > { %v1025_v60 = vpop.xlane.xlu0 %1024 }
 0x3ed   : > { %v1026_v61 = vsub.f32 %v1020_v52, %v1025_v60 }
 0x3ef   : > { %v1027_v62 = vmul.f32 1.442695, %v1026_v61 }
 0x3f0   : > { %v699_v63 = vpop.permute.xlu0 %698 }
 0x3f1   : > { %2277 = vpow2.f32 %v1027_v62  ;;  %v2943_v0 = vadd.f32 %v770_v39, %v699_v63  ;;  %v1995_v62 = vld [vmem:[%s3073_s7] ss:$0 sm:$0xff] }
 0x3f3   : > { %2080 = vmatpush3.msra.mxu1 %v2943_v0 }
 0x3f4   : > { %2089 = vmatprep.subr.mxu1 %v2542_v1  ;;  %v1261_v15 = vpop.permute.xlu0 %1260 }
 0x3f8   : > { %v1259_v18 = vpop.permute.xlu0 %1258 }
 0x3fb   : > { %v2278_v2 = vpop.eup %2277 }
 0x3fc   : > { %v1029_v3 = vsel %vm783_vm2, %v2278_v2, 0.0 }
 0x3fd   : > { %1030 = vadd.xlane.f32.xlu1 %v1029_v3 }
 0x40e   : > { %1035 = vrot.lane.b32.xlu1 %v2943_v0, %s2545_s18  ;;  %s3134_s18 = sld [smem:[#allocation26_spill]] }
 0x414   : > { %s3135_s11 = smov %s3134_s18  ;;  %s3016_s26 = scalar_lea.hbm %s3134_s18, %s1999_s9 }
 0x417   : > { %v868_v4 = vpop.xlane.xlu1 %867 }
 0x418   : > { %2279 = vrcp.f32 %v868_v4 }
 0x422   : > { %v2280_v5 = vpop.eup %2279 }
 0x423   : > { %v870_v6 = vmul.f32 %v2280_v5, %v2276_v58 }
 0x425   : > { %2082 = vmatmul.mubr.msk.f32.vlgmr.msra.gmra.mrb[4].mxu1 %vm783_vm2, %v870_v6 }
 0x426   : > { %2091 = vmatprep.mubr.msk.f32.mxu1 %vm2541_vm0, %v2542_v1 }
 0x48a   : > { %v1031_v8 = vpop.xlane.xlu1 %1030 }
 0x48b   : > { %2281 = vrcp.f32 %v1031_v8 }
 0x48e   : > { %v1036_v9 = vpop.permute.xlu1 %1035 }
 0x48f   : > { %2090 = vmatpush3.msra.mxu1 %v1036_v9 }
 0x490   : > { %2099 = vmatprep.subr.mxu1 %v2542_v1 }
 0x495   : > { %v2282_v10 = vpop.eup %2281 }
 0x496   : > { %v1033_v11 = vmul.f32 %v2282_v10, %v2278_v2 }
 0x498   : > { %2092 = vmatmul.mubr.msk.f32.vlgmr.msra.gmra.mrb[6].mxu1 %vm783_vm2, %v1033_v11 }
 0x499   : > { %2100 = vmatpush3.msra.mxu1 %v944_v12  ;;  %2101 = vmatprep.mubr.msk.f32.mxu1 %vm2541_vm0, %v2542_v1 }
 0x49a   : > { %2109 = vmatprep.subr.mxu1 %v2542_v1 }
 0x4f8   : > { %v940_v13 = vpop.f32.mrb[4].mxu1 }
 0x4f9   : > { %v2083_v14 = vpop.f32.mrb[5].mxu1  ;;  %2102 = vmatmul.mubr.msk.f32.vlgmr.msra.gmra.mrb[8].mxu1 %vm783_vm2, %v940_v13 }
 0x4fa   : > { %2111 = vmatprep.mubr.msk.f32.mxu1 %vm2541_vm0, %v2542_v1 }
 0x56b   : > { %v1107_v16 = vpop.f32.mrb[6].mxu1 }
 0x56c   : > { %v2093_v17 = vpop.f32.mrb[7].mxu1  ;;  %2097 = vmatmul.mubr.msk.f32.vlgmr.msra.gmra.mrb[6].mxu0 %vm783_vm2, %v1107_v16 }
 0x56d   : > { %2105 = vmatpush3.xpose.msk.msra.mxu0 %vm783_vm2, %v1261_v15  ;;  %2106 = vmatprep.mubr.msk.f32.mxu0 %vm2541_vm0, %v2542_v1  ;;  %v1996_v17 = vld [vmem:[%s3074_s8] ss:$0 sm:$0xff] }
 0x56e   : > { %2114 = vmatprep.subr.mxu0 %v2542_v1 }
 0x570   : > { %2107 = vmatmul.mubr.msk.f32.vlgmr.msra.gmra.mrb[8].mxu0 %vm783_vm2, %v1259_v18 }
 0x571   : > { %2116 = vmatprep.mubr.msk.f32.mxu0 %vm2541_vm0, %v2542_v1  ;;  %2115 = vmatpush3.msra.mxu0 %v1423_v40 }
 0x572   : > { %2124 = vmatprep.subr.mxu0 %v2542_v1 }
 0x5cc   : > { %v1254_v19 = vpop.f32.mrb[8].mxu1 }
 0x5cd   : > { %v2103_v20 = vpop.f32.mrb[9].mxu1 }
 0x5ce   : > { %v1997_v20 = vld [vmem:[%s3133_s28] ss:$0 sm:$0xff] }
 0x63f   : > { %v1181_v21 = vpop.f32.mrb[6].mxu0 }
 0x640   : > { %v1255_v22 = vadd.f32 %v1254_v19, %v1181_v21  ;;  %v2098_v23 = vpop.f32.mrb[7].mxu0 }
 0x643   : > { %v1332_v24 = vpop.f32.mrb[8].mxu0 }
 0x644   : > { %v1333_v25 = vadd.f32 %v1332_v24, %v2930_v46  ;;  %v2108_v26 = vpop.f32.mrb[9].mxu0 }
 0x646   : > { %v1336_v27 = vsel %vm783_vm2, %v1333_v25, -inf }
 0x647   : > { %1337 = vmax.xlane.f32.xlu1 %v1336_v27 }
 0x658   : > { %1500 = vrot.lane.b32.xlu1 %v2908_v35, %s2547_s27 }
 0x65c   : > { %1498 = vrot.lane.b32.xlu1 %v2895_v30, %s2547_s27 }
 0x6d4   : > { %v1338_v28 = vpop.xlane.xlu1 %1337 }
 0x6d5   : > { %v1339_v29 = vsub.f32 %v1333_v25, %v1338_v28 }
 0x6d7   : > { %v1340_v31 = vmul.f32 1.442695, %v1339_v29 }
 0x6d8   : > { %v1501_v38 = vpop.permute.xlu1 %1500 }
 0x6d9   : > { %2283 = vpow2.f32 %v1340_v31 }
 0x6dc   : > { %v1499_v39 = vpop.permute.xlu1 %1498 }
 0x6e3   : > { %v2284_v32 = vpop.eup %2283 }
 0x6e4   : > { %v1342_v34 = vsel %vm783_vm2, %v2284_v32, 0.0 }
 0x6e5   : > { %1343 = vadd.xlane.f32.xlu0 %v1342_v34 }
 0x6fb   : > { %1347 = vrot.lane.b32.xlu0 %v2943_v0, %s2546_s25  ;;  %s2447_s25 = scalar_lea.vmem %s2446_s17, 256 }
 0x6fc   : > { %p2449_p6 = scmp.lt.s32.totalorder %s2447_s25, %s2441_s24 }
 0x6fe   : > { %p2450_p8 = por %p2449_p6, %p2448_p10 }
 0x700   : > { %p2451_p0 = pnand %p2450_p8, %p2444_p11 }
 0x772   : > { %v1344_v36 = vpop.xlane.xlu0 %1343 }
 0x773   : > { %2285 = vrcp.f32 %v1344_v36 }
 0x776   : > { %v1348_v37 = vpop.permute.xlu0 %1347 }
 0x777   : > { %2110 = vmatpush3.msra.mxu1 %v1348_v37 }
 0x778   : > { %2119 = vmatprep.subr.mxu1 %v2542_v1 }
 0x77d   : > { %v2286_v35 = vpop.eup %2285 }
 0x77e   : > { %v1346_v30 = vmul.f32 %v2286_v35, %v2284_v32 }
 0x780   : > { %2112 = vmatmul.mubr.msk.f32.vlgmr.msra.gmra.mrb[10].mxu1 %vm783_vm2, %v1346_v30 }
 0x781   : > { %2120 = vmatpush3.xpose.msk.msra.mxu1 %vm783_vm2, %v1501_v38  ;;  %2121 = vmatprep.mubr.msk.f32.mxu1 %vm2541_vm0, %v2542_v1 }
 0x782   : > { %2129 = vmatprep.subr.mxu1 %v2542_v1 }
 0x784   : > { %2122 = vmatmul.mubr.msk.f32.vlgmr.msra.gmra.mrb[12].mxu1 %vm783_vm2, %v1499_v39 }
 0x785   : > { %2131 = vmatprep.mubr.msk.f32.mxu1 %vm2541_vm0, %v2542_v1 }
 0x853   : > { %v1419_v41 = vpop.f32.mrb[10].mxu1 }
 0x854   : > { %v2113_v42 = vpop.f32.mrb[11].mxu1  ;;  %2117 = vmatmul.mubr.msk.f32.vlgmr.msra.gmra.mrb[10].mxu0 %vm783_vm2, %v1419_v41 }
 0x855   : > { %2126 = vmatprep.mubr.msk.f32.mxu0 %vm2541_vm0, %v2542_v1  ;;  %v1663_v1 = vld [vmem:[#allocation10 + $0x18] sm:$0xff] }
 0x856   : > { %2130 = vmatpush3.msra.mxu1 %v1663_v1 }
 0x857   : > { %v1572_v43 = vpop.f32.mrb[12].mxu1 }
 0x858   : > { %v1573_v44 = vadd.f32 %v1572_v43, %v2930_v46  ;;  %v2123_v45 = vpop.f32.mrb[13].mxu1 }
 0x85a   : > { %v1576_v47 = vsel %vm783_vm2, %v1573_v44, -inf }
 0x85b   : > { %1577 = vmax.xlane.f32.xlu0 %v1576_v47 }
 0x871   : > { %1587 = vrot.lane.b32.xlu0 %v2943_v0, %s2547_s27 }
 0x8e8   : > { %v1578_v48 = vpop.xlane.xlu0 %1577 }
 0x8e9   : > { %v1579_v49 = vsub.f32 %v1573_v44, %v1578_v48 }
 0x8eb   : > { %v1580_v50 = vmul.f32 1.442695, %v1579_v49 }
 0x8ec   : > { %v1588_v51 = vpop.permute.xlu0 %1587 }
 0x8ed   : > { %2287 = vpow2.f32 %v1580_v50  ;;  %2125 = vmatpush3.msra.mxu0 %v1588_v51 }
 0x8f7   : > { %v2288_v52 = vpop.eup %2287 }
 0x8f8   : > { %v1582_v53 = vsel %vm783_vm2, %v2288_v52, 0.0 }
 0x8f9   : > { %1583 = vadd.xlane.f32.xlu1 %v1582_v53 }
 0x927   : > { %v1493_v46 = vpop.f32.mrb[10].mxu0 }
 0x928   : > { %v1497_v54 = vadd.f32 %v1493_v46, %v1255_v22  ;;  %v2118_v55 = vpop.f32.mrb[11].mxu0 }
 0x986   : > { %v1584_v56 = vpop.xlane.xlu1 %1583 }
 0x987   : > { %2289 = vrcp.f32 %v1584_v56 }
 0x991   : > { %v2290_v57 = vpop.eup %2289 }
 0x992   : > { %v1586_v58 = vmul.f32 %v2290_v57, %v2288_v52 }
 0x994   : > { %2127 = vmatmul.mubr.msk.f32.vlgmr.msra.gmra.mrb[12].mxu0 %vm783_vm2, %v1586_v58 }
 0xa67   : > { %v1659_v59 = vpop.f32.mrb[12].mxu0 }
 0xa68   : > { %v2128_v60 = vpop.f32.mrb[13].mxu0  ;;  %2132 = vmatmul.mubr.msk.f32.vlgmr.msra.gmra.mrb[14].mxu1 %vm783_vm2, %v1659_v59 }
 0xb3b   : > { %v1733_v61 = vpop.f32.mrb[14].mxu1 }
 0xb3c   : > { %v1737_v63 = vadd.f32 %v1733_v61, %v1497_v54  ;;  %v2133_v0 = vpop.f32.mrb[15].mxu1 }
 0xb3e   : > { %v1745_v2 = vadd.f32 %v1995_v62, %v1737_v63 }
 0xb40   : > { %v1749_v3 = vadd.f32 %v1745_v2, %v2902_v33 }
 0xb42   : > { %v1750_v4 = vsel %vm520_vm1, %v1749_v3, 0.0 }
 0xb43   : > { %1751 = vadd.xlane.f32.xlu1 %v1750_v4 }
 0xbd0   : > { %v1752_v5 = vpop.xlane.xlu1 %1751 }
 0xbd1   : > { %v1754_v6 = vmul.f32 0.03125, %v1752_v5 }
 0xbd3   : > { %v1755_v7 = vsub.f32 %v1749_v3, %v1754_v6 }
 0xbd5   : > { %v1756_v8 = vmul.f32 %v1755_v7, %v1755_v7 }
 0xbd7   : > { %v1757_v9 = vsel %vm520_vm1, %v1756_v8, 0.0 }
 0xbd8   : > { %1758 = vadd.xlane.f32.xlu1 %v1757_v9 }
 0xc65   : > { %v1759_v10 = vpop.xlane.xlu1 %1758 }
 0xc66   : > { %v1760_v11 = vmul.f32 0.032258064, %v1759_v10 }
 0xc68   : > { %2291 = vrsqrt.f32 %v1760_v11  ;;  %vm1763_vm4 = vcmp.eq.f32.partialorder %v1760_v11, inf  ;;  %v1766_v14 = vand.u32 2147483648, %v1760_v11  ;;  %vm1765_vm5 = vcmp.eq.f32.partialorder %v1760_v11, 0.0 }
 0xc72   : > { %v2292_v12 = vpop.eup %2291 }
 0xc73   : > { %v1762_v13 = vmul.f32 %v2292_v12, %v1760_v11 }
 0xc75   : > { %v1764_v33 = vsel %vm1763_vm4, %v1760_v11, %v1762_v13 }
 0xc76   : > { %v1767_v15 = vsel %vm1765_vm5, %v1766_v14, %v1764_v33 }
 0xc77   : > { %v1768_v16 = vadd.f32 1e-06, %v1767_v15 }
 0xc79   : > { %2293 = vrcp.f32 %v1768_v16 }
 0xc83   : > { %v2294_v18 = vpop.eup %2293 }
 0xc84   : > { %v1777_v19 = vmul.f32 %v2294_v18, %v1996_v17 }
 0xc86   : > { %v1778_v21 = vmul.f32 %v1777_v19, %v1755_v7 }
 0xc88   : > { %v1786_v22 = vadd.f32 %v1997_v20, %v1778_v21 }
 0xc8a   : > { %1787 = vst.msk [vmem:[%s502_s19] sm:$0xff] %vm520_vm1, %v1786_v22 }
 0xc8b   : > { %2454 = shalt.err (!%p2451_p0)
}
 0xc8c   : > { %s2455_s4 = scalar_lea.hbm %s3016_s26, 128  ;;  %s2459_s30 = scalar_lea.hbm %s3135_s11, 256 }
 0xc8d   : > { %p2456_p5 = scmp.ne.s32.totalorder %s3016_s26, %s2455_s4  ;;  %p2460_p13 = scmp.lt.u32.totalorder %s3016_s26, %s3135_s11 }
 0xc8e   : > { %p2461_p9 = scmp.lt.u32.totalorder %s2459_s30, %s2455_s4  ;;  %p2463_p4 = scmp.lt.u32.totalorder %s2455_s4, %s3016_s26 }
 0xc8f   : > { %p2457_p12 = pnand %p2456_p5, %p3136_p1 }
 0xc90   : > { %p2462_p2 = por %p2461_p9, %p2460_p13 }
 0xc91   : > { %p2458_p7 = pneg %p2457_p12 }
 0xc92   : > { %p2464_p3 = por %p2463_p4, %p2462_p2 }
 0xc94   : > { %p2465_p11 = pnand %p2464_p3, %p2458_p7 }
 0xc96   : > { %2468 = shalt.err (!%p2465_p11)
}
 0xc97   : > { %2166 = dma.vmem_to_hbm [thread:$0]  (%p3136_p1), %s3018_s21, 128, %s3016_s26, %s1789_s22  }
 0xc98 PF: > { %s3137_s13 = sld [smem:[#allocation16_spill]]  ;;  %s3138_s23 = sld [smem:[#allocation19_spill]] }
 0xc99   : > { %s3139_s28 = sld [smem:[#allocation18_spill]] }
 0xc9e   : > { %s1815_s9 = sand.u32 1, %s3137_s13   ;;  %p3140_p10 = scmp.ne.s32.totalorder %s3138_s23, 0 }
 0xc9f   : > { %p3141_p6 = scmp.ge.s32.totalorder %s3139_s28, 2  ;;  %s1816_s19 = scalar_lea.sflag [#allocation4], %s1815_s9 }
 0xca1   : > { %p2186_p8 = pnand %p3141_p6, %p3140_p10 }
 0xca3   : > { %2506 = dma.done.wait (!%p2186_p8), %s1816_s19, 128  }
 0xca4   : > { %2508 = vsyncadd (!%p2186_p8), %s1816_s19, 4294967168  ;;  %s30_s18 = sadd.s32 1, %s3139_s28   ;;  %s3142_s12 = sld [smem:[#allocation21_spill]] }
 0xca5   : > { %p27_p0 = scmp.ge.s32.totalorder %s30_s18, 4   ;;  %s3143_s16 = sld [smem:[#allocation17_spill]] }
 0xca6   : > { %s3144_s17 = sld [smem:[#allocation20_spill]]  ;;  %s3145_s13 = smov %s2515_s14 }
 0xca7   : > { %s3146_s14 = smov %s2519_s15  ;;  %29 = sbr.rel (!%p27_p0) target bundleno = 15 (0xf), region = 141 }
 0xcaa   : > { %s3147_s15 = smov %s3142_s12 }
 0xcae   :  { %1821 = vsyncpa [#allocation3], 1 }
 0xcaf   :  { %1823 = vsyncpa [#allocation3 + $0x1], 1 }
 0xcb0   :  { %1824 = vsyncpa [#allocation6], 1 }
 0xcb1   :  { %1826 = vsyncpa [#allocation6 + $0x1], 1 }
 0xcb2   :  { %1827 = vsyncpa [#allocation9], 1 }
 0xcb3   :  { %1828 = vsyncpa [#allocation4], 1 }
 0xcb4   :  { %1830 = vsyncpa [#allocation4 + $0x1], 1 }

</bundles_post_ra>
